<compile_context>
chip_gen: v7x
topology: tpu7x:2x2x1
jax: 0.10.0
libtpu: 0.0.40
codegen_flags: <defaults>
</compile_context>

<pallas_src>
import numpy as np
import jax
import jax.numpy as jnp
from jax import lax
from jax.experimental import pallas as pl
from jax.experimental.pallas import tpu as pltpu

NEG_INF = np.float32(-10000000000.0)
ML_W = 20          # self.mL_w in the PyTorch module
N_PAD = 128        # lane-dense padded output width (sliced back to n_order)
SUB_BF16 = 16      # bf16 sublane tile -> layout-preserving (B,mL,hS)<->(B*mL,hS)


# --------------------------------------------------------------------------
# Plain-JAX bidirectional LSTM (pack/pad semantics), eval mode (no dropout).
# --------------------------------------------------------------------------
def _lstm_cell(x, h, c, Wih, Whh, bih, bhh):
    g = x @ Wih.T + h @ Whh.T + bih + bhh
    i, f, gg, o = jnp.split(g, 4, axis=-1)          # PyTorch gate order i,f,g,o
    i = jax.nn.sigmoid(i)
    f = jax.nn.sigmoid(f)
    gg = jnp.tanh(gg)
    o = jax.nn.sigmoid(o)
    c2 = f * c + i * gg
    h2 = o * jnp.tanh(c2)
    return h2, c2


def _reverse_within_length(x, lengths):
    # reverse each sequence inside its valid length (pad positions untouched)
    T = x.shape[1]
    t = jnp.arange(T)[None, :]
    idx = jnp.where(t < lengths[:, None], lengths[:, None] - 1 - t, t)
    return jnp.take_along_axis(x, idx[:, :, None], axis=1)


def _run_direction(x, lengths, params, reverse):
    Wih, Whh, bih, bhh = params
    B, T, _ = x.shape
    H = Whh.shape[1]
    xd = _reverse_within_length(x, lengths) if reverse else x
    mask = (jnp.arange(T)[None, :] < lengths[:, None]).astype(x.dtype)   # [B,T]

    def step(carry, inp):
        h, c = carry
        xt, mt = inp                                  # [B,D], [B,1]
        h2, c2 = _lstm_cell(xt, h, c, Wih, Whh, bih, bhh)
        h = mt * h2 + (1.0 - mt) * h
        c = mt * c2 + (1.0 - mt) * c
        out = mt * h2                                 # zeros at padded steps
        return (h, c), out

    h0 = jnp.zeros((B, H), x.dtype)
    c0 = jnp.zeros((B, H), x.dtype)
    xs = jnp.swapaxes(xd, 0, 1)
    ms = jnp.swapaxes(mask[:, :, None], 0, 1)
    _, outs = lax.scan(step, (h0, c0), (xs, ms))
    outs = jnp.swapaxes(outs, 0, 1)
    if reverse:
        outs = _reverse_within_length(outs, lengths)
    return outs


def bilstm(x, lengths, layer_params):
    out = x
    for lp in layer_params:
        of = _run_direction(out, lengths, lp["fwd"], reverse=False)
        ob = _run_direction(out, lengths, lp["bwd"], reverse=True)
        out = jnp.concatenate([of, ob], axis=-1)
    return out


def encode_hpu(layer_params, wemb_hpu, l_hpu, l_hs_list, hS):
    # encode every header token sequence, grab the output at its last valid
    # position, then pack per-batch header groups into [bS, mL_hs, hS].
    outs = bilstm(wemb_hpu, l_hpu, layer_params)                  # [Nhpu, T, hS]
    last_idx = (l_hpu - 1)[:, None, None]
    wenc_hpu = jnp.take_along_axis(outs, jnp.broadcast_to(
        last_idx, (outs.shape[0], 1, hS)), axis=1)[:, 0, :]       # [Nhpu, hS]
    bS = len(l_hs_list)
    mL_hs = max(l_hs_list)
    wenc_hs = jnp.zeros((bS, mL_hs, hS), jnp.float32)
    st = 0
    for b, lh in enumerate(l_hs_list):
        wenc_hs = wenc_hs.at[b, :lh].set(wenc_hpu[st:st + lh])
        st += lh
    return wenc_hs


def build_wenc_hs_ob(wenc_hs, wn_list, wc_list, mL_w):
    # torch: real = [wenc_hs[b, col] for col in wc[b]];
    #        pad  = (mL_w - wn[b]) * [wenc_hs[b, 0]]
    bS = wenc_hs.shape[0]
    idx = np.zeros((bS, mL_w), np.int32)              # pad slots -> column 0
    for b in range(bS):
        for j, col in enumerate(wc_list[b][:wn_list[b]]):
            idx[b, j] = col
    idx = jnp.asarray(idx)
    return wenc_hs[jnp.arange(bS)[:, None], idx]      # [bS, mL_w, hS]


# --------------------------------------------------------------------------
# Pallas kernel: batched attention + ord_out scoring hot path.
# --------------------------------------------------------------------------
def word_kernel(ln_ref,                               # SMEM (bS_pad,) int32
                n_ref, hs_ref,                        # VMEM activations (bf16)
                watt_ref, mhead_ref, bmid_ref, w2_ref, b2_ref,   # weights
                out_ref):                             # (Bt*mL_w, N_PAD) bf16
    Bt, mL_n, hS = n_ref.shape
    mL_w = hs_ref.shape[1]

    n = n_ref[...]                                    # (Bt, mL_n, hS) bf16
    hs = hs_ref[...]                                  # (Bt, mL_w, hS) bf16

    # W_att projection folded into one 2-D MXU matmul over all rows.
    # (b_att dropped: it only adds a per-(b,w) constant along the softmax axis.)
    att_n = jnp.dot(n.reshape(Bt * mL_n, hS), watt_ref[...],
                    preferred_element_type=jnp.float32)
    att_n = att_n.astype(jnp.bfloat16).reshape(Bt, mL_n, hS)

    # Attention scores: contract last dims (no transpose materialized).
    # att[b, w, q] = sum_d hs[b, w, d] * att_n[b, q, d]
    att = lax.dot_general(hs, att_n,
                          dimension_numbers=(((2,), (2,)), ((0,), (0,))),
                          preferred_element_type=jnp.float32)     # (Bt,mL_w,mL_n)

    # Question-length masking from SMEM scalars (additive -1e10), f32 softmax.
    base = pl.program_id(0) * Bt
    col = lax.broadcasted_iota(jnp.int32, (1, mL_n), 1)           # (1, mL_n)
    rows = [jnp.where(col < ln_ref[base + b], 0.0, NEG_INF) for b in range(Bt)]
    att = att + jnp.stack(rows, axis=0)               # (Bt,1,mL_n) broadcast

    m = jnp.max(att, axis=-1, keepdims=True)
    e = jnp.exp(att - m)
    p = e * pl.reciprocal(jnp.sum(e, axis=-1, keepdims=True), approx=True)

    # Context: c[b, w, d] = sum_q p[b, w, q] * wenc_n[b, q, d]
    c = lax.dot_general(p.astype(jnp.bfloat16), n,
                        dimension_numbers=(((2,), (1,)), ((0,), (0,))),
                        preferred_element_type=jnp.float32)       # (Bt,mL_w,hS)

    # Fused ord head: pre = [c, hs] @ [M_c; M_hs] + b_mid ; h = tanh(pre)
    # (W_c / W_hs / ord_out[0] composed in the wrapper; single K=2*hS matmul.)
    x = jnp.concatenate([c.astype(jnp.bfloat16).reshape(Bt * mL_w, hS),
                         hs.reshape(Bt * mL_w, hS)], axis=-1)     # (Bt*mL_w,2hS)
    h = jnp.tanh(jnp.dot(x, mhead_ref[...],
                         preferred_element_type=jnp.float32) + bmid_ref[...])

    # Final Linear(hS, n_order) padded to 128 lanes -> unmasked full-lane store.
    s = jnp.dot(h.astype(jnp.bfloat16), w2_ref[...],
                preferred_element_type=jnp.float32) + b2_ref[...]  # (Bt*mL_w,128)
    out_ref[...] = s.astype(out_ref.dtype)


def word_score(wenc_n, wenc_hs_ob, l_n, lin, n_order, max_bt=64):
    bS, mL_n, hS = wenc_n.shape
    mL_w = wenc_hs_ob.shape[1]

    # Pad seq dims to the bf16 sublane tile so in-kernel reshapes are
    # layout-preserving (no per-step VMEM relayouts).
    mL_n_pad = -(-mL_n // SUB_BF16) * SUB_BF16
    mL_w_pad = -(-mL_w // SUB_BF16) * SUB_BF16

    def block_bytes(bt):          # activation blocks, bf16
        return (bt * mL_n_pad * hS * 2
                + bt * mL_w_pad * hS * 2
                + bt * mL_w_pad * N_PAD * 2)

    # >= 2 grid steps so both v7x TensorCores get work; otherwise one step
    # covers half the padded batch, capped by a conservative double-buffered
    # VMEM budget (fits the 16 MiB default scoped VMEM of v5e with headroom).
    nb = 2 if bS > 1 else 1
    Bt = -(-bS // nb)
    while Bt > 1 and (2 * block_bytes(Bt) > 16 * 2**20 or Bt > max_bt):
        nb += 1
        Bt = -(-bS // nb)
    bS_pad = nb * Bt

    wenc_n_p = jnp.pad(wenc_n, ((0, bS_pad - bS), (0, mL_n_pad - mL_n), (0, 0)))
    wenc_hs_p = jnp.pad(wenc_hs_ob,
                        ((0, bS_pad - bS), (0, mL_w_pad - mL_w), (0, 0)))
    l_n_pad = jnp.concatenate(
        [l_n.astype(jnp.int32), jnp.full((bS_pad - bS,), mL_n, jnp.int32)])

    # Fold W_c / W_hs (and their biases) into ord_out[0] (linear composition),
    # and stack them so the kernel does a single K=2*hS matmul.
    A1 = lin["W_o1"][:, :hS]                       # (hS, hS) acting on W_c(c_n)
    A2 = lin["W_o1"][:, hS:]                       # (hS, hS) acting on W_hs(hs)
    M_c = lin["W_c"].T @ A1.T                      # (hS, hS)
    M_hs = lin["W_hs"].T @ A2.T                    # (hS, hS)
    M_head = jnp.concatenate([M_c, M_hs], axis=0)  # (2*hS, hS)
    b_mid = (lin["b_c"] @ A1.T + lin["b_hs"] @ A2.T + lin["b_o1"]).reshape(1, hS)
    # Final projection padded to a lane-dense 128-wide slab.
    W2p = jnp.zeros((hS, N_PAD), jnp.float32).at[:, :n_order].set(lin["W_o2"].T)
    b2p = jnp.zeros((1, N_PAD), jnp.float32).at[0, :n_order].set(lin["b_o2"])

    bf = jnp.bfloat16
    vmem_limit = int(min(48 * 2**20,
                         max(16 * 2**20, 4 * block_bytes(Bt) + 2 * 2**20)))
    full2 = lambda i, ln: (0, 0)

    grid_spec = pltpu.PrefetchScalarGridSpec(
        num_scalar_prefetch=1,                       # l_n -> SMEM
        grid=(nb,),
        in_specs=[
            pl.BlockSpec((Bt, mL_n_pad, hS), lambda i, ln: (i, 0, 0)),  # wenc_n
            pl.BlockSpec((Bt, mL_w_pad, hS), lambda i, ln: (i, 0, 0)),  # wenc_hs
            pl.BlockSpec((hS, hS), full2),                              # W_att^T
            pl.BlockSpec((2 * hS, hS), full2),                          # [M_c;M_hs]
            pl.BlockSpec((1, hS), full2),                               # b_mid
            pl.BlockSpec((hS, N_PAD), full2),                           # W_out
            pl.BlockSpec((1, N_PAD), full2),                            # b_out
        ],
        out_specs=pl.BlockSpec((Bt * mL_w_pad, N_PAD), lambda i, ln: (i, 0)),
    )

    out = pl.pallas_call(
        word_kernel,
        out_shape=jax.ShapeDtypeStruct((bS_pad * mL_w_pad, N_PAD), jnp.bfloat16),
        grid_spec=grid_spec,
        compiler_params=pltpu.CompilerParams(
            dimension_semantics=("parallel",),
            vmem_limit_bytes=vmem_limit),
    )(l_n_pad,
      wenc_n_p.astype(bf),
      wenc_hs_p.astype(bf),
      lin["W_att"].T.astype(bf),
      M_head.astype(bf),
      b_mid.astype(jnp.float32),
      W2p.astype(bf),
      b2p)

    # 3-D view + n_order slice + f32 cast done in the wrapper (XLA), not in
    # the kernel (keeps the kernel's stores full-lane and layout-preserving).
    out = out.reshape(bS_pad, mL_w_pad, N_PAD)
    return out[:bS, :mL_w, :n_order].astype(jnp.float32)


# --------------------------------------------------------------------------
# Parameter init (deterministic, PyTorch-style uniform ranges) & reference.
# --------------------------------------------------------------------------
def init_lstm(key, input_size, hidden_size, num_layers):
    params = []
    bound = 1.0 / np.sqrt(hidden_size)
    for layer in range(num_layers):
        in_sz = input_size if layer == 0 else 2 * hidden_size
        lp = {}
        for d in ("fwd", "bwd"):
            key, k1, k2, k3, k4 = jax.random.split(key, 5)
            lp[d] = (
                jax.random.uniform(k1, (4 * hidden_size, in_sz), jnp.float32, -bound, bound),
                jax.random.uniform(k2, (4 * hidden_size, hidden_size), jnp.float32, -bound, bound),
                jax.random.uniform(k3, (4 * hidden_size,), jnp.float32, -bound, bound),
                jax.random.uniform(k4, (4 * hidden_size,), jnp.float32, -bound, bound),
            )
        params.append(lp)
    return params, key


def init_linear(key, in_f, out_f):
    bound = 1.0 / np.sqrt(in_f)
    key, k1, k2 = jax.random.split(key, 3)
    W = jax.random.uniform(k1, (out_f, in_f), jnp.float32, -bound, bound)
    b = jax.random.uniform(k2, (out_f,), jnp.float32, -bound, bound)
    return W, b, key


def word_score_ref(wenc_n, wenc_hs_ob, l_n, lin):
    mL_n = wenc_n.shape[1]
    att_n = wenc_n @ lin["W_att"].T + lin["b_att"]                 # [bS,mL_n,hS]
    att = jnp.einsum("bnd,bwd->bwn", att_n, wenc_hs_ob)            # [bS,mL_w,mL_n]
    mask = jnp.arange(mL_n)[None, None, :] < l_n[:, None, None]
    att = jnp.where(mask, att, NEG_INF)
    p = jax.nn.softmax(att, axis=2)
    c_n = jnp.einsum("bwn,bnd->bwd", p, wenc_n)
    vec = jnp.concatenate(
        [c_n @ lin["W_c"].T + lin["b_c"],
         wenc_hs_ob @ lin["W_hs"].T + lin["b_hs"]], axis=-1)
    h = jnp.tanh(vec @ lin["W_o1"].T + lin["b_o1"])
    return h @ lin["W_o2"].T + lin["b_o2"]                         # [bS,mL_w,n_order]


# --------------------------------------------------------------------------
if __name__ == "__main__":
    # module hyper-params (small, consistent with WORD(iS, hS, lS, n_order))
    iS, hS, lS, n_order = 16, 32, 2, 5
    H = hS // 2

    key = jax.random.PRNGKey(0)
    enc_n_params, key = init_lstm(key, iS, H, lS)
    enc_h_params, key = init_lstm(key, iS, H, lS)
    W_att, b_att, key = init_linear(key, hS, hS)
    W_c, b_c, key = init_linear(key, hS, hS)
    W_hs, b_hs, key = init_linear(key, hS, hS)
    W_o1, b_o1, key = init_linear(key, 2 * hS, hS)      # ord_out[0]
    W_o2, b_o2, key = init_linear(key, hS, n_order)     # ord_out[2]
    lin = dict(W_att=W_att, b_att=b_att, W_c=W_c, b_c=b_c,
               W_hs=W_hs, b_hs=b_hs, W_o1=W_o1, b_o1=b_o1,
               W_o2=W_o2, b_o2=b_o2)

    # inputs
    bS = 2
    l_n_list = [8, 6]
    mL_n = max(l_n_list)
    l_hs_list = [3, 2]                     # headers per table
    l_hpu_list = [4, 3, 2, 5, 3]           # sum == sum(l_hs_list) header units
    mL_hpu = max(l_hpu_list)
    wn_list = [2, 1]                       # number of where-conditions
    wc_list = [[1, 0], [1]]                # selected where columns per batch

    key, k1, k2 = jax.random.split(key, 3)
    wemb_n = jax.random.normal(k1, (bS, mL_n, iS), jnp.float32)
    wemb_hpu = jax.random.normal(k2, (len(l_hpu_list), mL_hpu, iS), jnp.float32)

    l_n = jnp.asarray(l_n_list, jnp.int32)
    l_hpu = jnp.asarray(l_hpu_list, jnp.int32)

    # encoders (plain JAX, eval mode; LSTM inter-layer dropout is a no-op)
    wenc_n = bilstm(wemb_n, l_n, enc_n_params)                          # [bS,mL_n,hS]
    wenc_hs = encode_hpu(enc_h_params, wemb_hpu, l_hpu, l_hs_list, hS)  # [bS,mL_hs,hS]
    wenc_hs_ob = build_wenc_hs_ob(wenc_hs, wn_list, wc_list, ML_W)      # [bS,20,hS]

    # Pallas hot path
    s_ord = word_score(wenc_n, wenc_hs_ob, l_n, lin, n_order)
    s_ord = jax.block_until_ready(s_ord)

    # correctness check against a pure-JAX f32 reference of the scoring path
    # (kernel uses bf16 MXU operands and a bf16 output slab -> looser tolerance;
    # real bugs would produce O(0.1-1) errors).
    ref = jax.block_until_ready(word_score_ref(wenc_n, wenc_hs_ob, l_n, lin))
    assert s_ord.shape == (bS, ML_W, n_order)
    assert np.allclose(np.asarray(s_ord), np.asarray(ref), rtol=3e-2, atol=3e-2), (
        np.max(np.abs(np.asarray(s_ord) - np.asarray(ref))))

    print("KERNEL_OK")
</pallas_src>

<mosaic_0001>
module attributes {stable_mosaic.version = 11 : i64} {
  func.func @word_kernel(%arg0: i32, %arg1: memref<2xi32, #tpu.memory_space<smem>>, %arg2: memref<1x16x32xbf16, #tpu.memory_space<vmem>>, %arg3: memref<1x32x32xbf16, #tpu.memory_space<vmem>>, %arg4: memref<32x32xbf16, #tpu.memory_space<vmem>>, %arg5: memref<64x32xbf16, #tpu.memory_space<vmem>>, %arg6: memref<1x32xf32, #tpu.memory_space<vmem>>, %arg7: memref<32x128xbf16, #tpu.memory_space<vmem>>, %arg8: memref<1x128xf32, #tpu.memory_space<vmem>>, %arg9: memref<32x128xbf16, #tpu.memory_space<vmem>>) attributes {dimension_semantics = [#tpu.dimension_semantics<parallel>], iteration_bounds = array<i64: 2>, scalar_prefetch = 1 : i64, scratch_operands = 0 : i64, tpu.core_type = #tpu.core_type<tc>, window_params = [{transform_indices = @transform_0, window_bounds = array<i64: 1, 16, 32>}, {transform_indices = @transform_1, window_bounds = array<i64: 1, 32, 32>}, {pipeline_mode = #tpu.pipeline_mode<synchronous>, transform_indices = @transform_2, window_bounds = array<i64: 32, 32>}, {pipeline_mode = #tpu.pipeline_mode<synchronous>, transform_indices = @transform_3, window_bounds = array<i64: 64, 32>}, {pipeline_mode = #tpu.pipeline_mode<synchronous>, transform_indices = @transform_4, window_bounds = array<i64: 1, 32>}, {pipeline_mode = #tpu.pipeline_mode<synchronous>, transform_indices = @transform_5, window_bounds = array<i64: 32, 128>}, {pipeline_mode = #tpu.pipeline_mode<synchronous>, transform_indices = @transform_6, window_bounds = array<i64: 1, 128>}, {transform_indices = @transform_7, window_bounds = array<i64: 32, 128>}]} {
    %c0 = arith.constant 0 : index
    %c0_0 = arith.constant 0 : index
    %c0_1 = arith.constant 0 : index
    %0 = vector.load %arg2[%c0, %c0_0, %c0_1] : memref<1x16x32xbf16, #tpu.memory_space<vmem>>, vector<1x16x32xbf16>
    %c0_2 = arith.constant 0 : index
    %c0_3 = arith.constant 0 : index
    %c0_4 = arith.constant 0 : index
    %1 = vector.load %arg3[%c0_2, %c0_3, %c0_4] : memref<1x32x32xbf16, #tpu.memory_space<vmem>>, vector<1x32x32xbf16>
    %2 = vector.shape_cast %0 : vector<1x16x32xbf16> to vector<16x32xbf16>
    %c0_5 = arith.constant 0 : index
    %c0_6 = arith.constant 0 : index
    %3 = vector.load %arg4[%c0_5, %c0_6] : memref<32x32xbf16, #tpu.memory_space<vmem>>, vector<32x32xbf16>
    %cst = arith.constant dense<0.000000e+00> : vector<16x32xf32>
    %4 = tpu.matmul %2, %3, %cst {dimension_numbers = #tpu.dot_dimension_numbers<[1], [0], [0], [1], [0, 0, 1, 1], [], []>} : vector<16x32xbf16>, vector<32x32xbf16>, vector<16x32xf32> -> vector<16x32xf32>
    %5 = arith.truncf %4 : vector<16x32xf32> to vector<16x32xbf16>
    %6 = vector.shape_cast %5 : vector<16x32xbf16> to vector<1x16x32xbf16>
    %cst_7 = arith.constant dense<0.000000e+00> : vector<1x32x16xf32>
    %7 = tpu.matmul %1, %6, %cst_7 {dimension_numbers = #tpu.dot_dimension_numbers<[2], [2], [1], [1], [0, 0, 0, 1, 1, 1], [0], [0]>} : vector<1x32x32xbf16>, vector<1x16x32xbf16>, vector<1x32x16xf32> -> vector<1x32x16xf32>
    %c1_i32 = arith.constant 1 : i32
    %8 = arith.muli %arg0, %c1_i32 : i32
    %9 = tpu.iota {dimensions = array<i32: 1>} : vector<1x16xi32>
    %c0_i32 = arith.constant 0 : i32
    %10 = arith.addi %8, %c0_i32 : i32
    %11 = arith.index_cast %10 : i32 to index
    %12 = memref.load %arg1[%11] : memref<2xi32, #tpu.memory_space<smem>>
    %13 = vector.broadcast %12 : i32 to vector<1x16xi32>
    %14 = arith.cmpi slt, %9, %13 : vector<1x16xi32>
    %cst_8 = arith.constant 0.000000e+00 : f32
    %cst_9 = arith.constant -1.000000e+10 : f32
    %15 = vector.broadcast %cst_8 : f32 to vector<1x16xf32>
    %16 = vector.broadcast %cst_9 : f32 to vector<1x16xf32>
    %17 = arith.select %14, %15, %16 : vector<1x16xi1>, vector<1x16xf32>
    %18 = vector.shape_cast %17 : vector<1x16xf32> to vector<1x1x16xf32>
    %19 = vector.broadcast %18 : vector<1x1x16xf32> to vector<1x32x16xf32>
    %20 = arith.addf %7, %19 : vector<1x32x16xf32>
    %cst_10 = arith.constant dense<0xFF800000> : vector<1x32xf32>
    %21 = vector.multi_reduction <maximumf>, %20, %cst_10 [2] : vector<1x32x16xf32> to vector<1x32xf32>
    %22 = vector.shape_cast %21 : vector<1x32xf32> to vector<1x32x1xf32>
    %23 = vector.broadcast %22 : vector<1x32x1xf32> to vector<1x32x16xf32>
    %24 = arith.subf %20, %23 : vector<1x32x16xf32>
    %25 = math.exp %24 : vector<1x32x16xf32>
    %cst_11 = arith.constant dense<0.000000e+00> : vector<1x32xf32>
    %26 = vector.multi_reduction <add>, %25, %cst_11 [2] : vector<1x32x16xf32> to vector<1x32xf32>
    %27 = vector.shape_cast %26 : vector<1x32xf32> to vector<1x32x1xf32>
    %28 = tpu.reciprocal %27 {approx = true} : vector<1x32x1xf32> -> vector<1x32x1xf32>
    %29 = vector.broadcast %28 : vector<1x32x1xf32> to vector<1x32x16xf32>
    %30 = arith.mulf %25, %29 : vector<1x32x16xf32>
    %31 = arith.truncf %30 : vector<1x32x16xf32> to vector<1x32x16xbf16>
    %cst_12 = arith.constant dense<0.000000e+00> : vector<1x32x32xf32>
    %32 = tpu.matmul %31, %0, %cst_12 {dimension_numbers = #tpu.dot_dimension_numbers<[2], [1], [1], [2], [0, 0, 0, 1, 1, 2], [0], [0]>} : vector<1x32x16xbf16>, vector<1x16x32xbf16>, vector<1x32x32xf32> -> vector<1x32x32xf32>
    %33 = arith.truncf %32 : vector<1x32x32xf32> to vector<1x32x32xbf16>
    %34 = vector.shape_cast %33 : vector<1x32x32xbf16> to vector<32x32xbf16>
    %35 = vector.shape_cast %1 : vector<1x32x32xbf16> to vector<32x32xbf16>
    %36 = tpu.concatenate %34, %35 in 1 : vector<32x32xbf16>, vector<32x32xbf16> -> vector<32x64xbf16>
    %c0_13 = arith.constant 0 : index
    %c0_14 = arith.constant 0 : index
    %37 = vector.load %arg5[%c0_13, %c0_14] : memref<64x32xbf16, #tpu.memory_space<vmem>>, vector<64x32xbf16>
    %cst_15 = arith.constant dense<0.000000e+00> : vector<32x32xf32>
    %38 = tpu.matmul %36, %37, %cst_15 {dimension_numbers = #tpu.dot_dimension_numbers<[1], [0], [0], [1], [0, 0, 1, 1], [], []>} : vector<32x64xbf16>, vector<64x32xbf16>, vector<32x32xf32> -> vector<32x32xf32>
    %c0_16 = arith.constant 0 : index
    %c0_17 = arith.constant 0 : index
    %39 = vector.load %arg6[%c0_16, %c0_17] : memref<1x32xf32, #tpu.memory_space<vmem>>, vector<1x32xf32>
    %40 = vector.broadcast %39 : vector<1x32xf32> to vector<32x32xf32>
    %41 = arith.addf %38, %40 : vector<32x32xf32>
    %42 = math.tanh %41 : vector<32x32xf32>
    %43 = arith.truncf %42 : vector<32x32xf32> to vector<32x32xbf16>
    %c0_18 = arith.constant 0 : index
    %c0_19 = arith.constant 0 : index
    %44 = vector.load %arg7[%c0_18, %c0_19] : memref<32x128xbf16, #tpu.memory_space<vmem>>, vector<32x128xbf16>
    %cst_20 = arith.constant dense<0.000000e+00> : vector<32x128xf32>
    %45 = tpu.matmul %43, %44, %cst_20 {dimension_numbers = #tpu.dot_dimension_numbers<[1], [0], [0], [1], [0, 0, 1, 1], [], []>} : vector<32x32xbf16>, vector<32x128xbf16>, vector<32x128xf32> -> vector<32x128xf32>
    %c0_21 = arith.constant 0 : index
    %c0_22 = arith.constant 0 : index
    %46 = vector.load %arg8[%c0_21, %c0_22] : memref<1x128xf32, #tpu.memory_space<vmem>>, vector<1x128xf32>
    %47 = vector.broadcast %46 : vector<1x128xf32> to vector<32x128xf32>
    %48 = arith.addf %45, %47 : vector<32x128xf32>
    %49 = arith.truncf %48 : vector<32x128xf32> to vector<32x128xbf16>
    %c0_23 = arith.constant 0 : index
    %c0_24 = arith.constant 0 : index
    %50 = vector.load %arg9[%c0_23, %c0_24] : memref<32x128xbf16, #tpu.memory_space<vmem>>, vector<32x128xbf16>
    tpu.vector_store %arg9[%c0_23, %c0_24], %49 {strides = array<i32>} : memref<32x128xbf16, #tpu.memory_space<vmem>>, vector<32x128xbf16>,
    return
  }
  func.func @transform_0(%arg0: i32, %arg1: memref<2xi32, #tpu.memory_space<smem>>) -> (i32, i32, i32) {
    %c0_i32 = arith.constant 0 : i32
    %c0_i32_0 = arith.constant 0 : i32
    %c0_i32_1 = arith.constant 0 : i32
    return %arg0, %c0_i32, %c0_i32_0 : i32, i32, i32
  }
  func.func @transform_1(%arg0: i32, %arg1: memref<2xi32, #tpu.memory_space<smem>>) -> (i32, i32, i32) {
    %c0_i32 = arith.constant 0 : i32
    %c0_i32_0 = arith.constant 0 : i32
    %c0_i32_1 = arith.constant 0 : i32
    return %arg0, %c0_i32, %c0_i32_0 : i32, i32, i32
  }
  func.func @transform_2(%arg0: i32, %arg1: memref<2xi32, #tpu.memory_space<smem>>) -> (i32, i32) {
    %c0_i32 = arith.constant 0 : i32
    %c0_i32_0 = arith.constant 0 : i32
    %c0_i32_1 = arith.constant 0 : i32
    return %c0_i32, %c0_i32_0 : i32, i32
  }
  func.func @transform_3(%arg0: i32, %arg1: memref<2xi32, #tpu.memory_space<smem>>) -> (i32, i32) {
    %c0_i32 = arith.constant 0 : i32
    %c0_i32_0 = arith.constant 0 : i32
    %c0_i32_1 = arith.constant 0 : i32
    return %c0_i32, %c0_i32_0 : i32, i32
  }
  func.func @transform_4(%arg0: i32, %arg1: memref<2xi32, #tpu.memory_space<smem>>) -> (i32, i32) {
    %c0_i32 = arith.constant 0 : i32
    %c0_i32_0 = arith.constant 0 : i32
    %c0_i32_1 = arith.constant 0 : i32
    return %c0_i32, %c0_i32_0 : i32, i32
  }
  func.func @transform_5(%arg0: i32, %arg1: memref<2xi32, #tpu.memory_space<smem>>) -> (i32, i32) {
    %c0_i32 = arith.constant 0 : i32
    %c0_i32_0 = arith.constant 0 : i32
    %c0_i32_1 = arith.constant 0 : i32
    return %c0_i32, %c0_i32_0 : i32, i32
  }
  func.func @transform_6(%arg0: i32, %arg1: memref<2xi32, #tpu.memory_space<smem>>) -> (i32, i32) {
    %c0_i32 = arith.constant 0 : i32
    %c0_i32_0 = arith.constant 0 : i32
    %c0_i32_1 = arith.constant 0 : i32
    return %c0_i32, %c0_i32_0 : i32, i32
  }
  func.func @transform_7(%arg0: i32, %arg1: memref<2xi32, #tpu.memory_space<smem>>) -> (i32, i32) {
    %c0_i32 = arith.constant 0 : i32
    %c0_i32_0 = arith.constant 0 : i32
    return %arg0, %c0_i32 : i32, i32
  }
}

</mosaic_0001>

<bundles_post_ra>
// kernel: tpu_custom_call.1
= control target key start
LH: loop header
LB: loop body
LE: loop exit
PB: predicated region body
PF: predicated region fallthrough
CT: control target
= control target key end

     0   :  { %s1452_s0 = inlined_call_operand.vmem [shape: s32[2], index: 0, kind: input, shape index: {}]   ;;  %s1453_s1 = inlined_call_operand.vmem [shape: bf16[2,16,32], index: 1, kind: input, shape index: {}]   ;;  %s1454_s2 = inlined_call_operand.vmem [shape: bf16[2,32,32], index: 2, kind: input, shape index: {}]   ;;  %s1455_s3 = inlined_call_operand.hbm [shape: bf16[32,32], index: 3, kind: input, shape index: {}]   ;;  %s1456_s4 = inlined_call_operand.vmem [shape: bf16[64,32], index: 4, kind: input, shape index: {}]   ;;  %s1457_s5 = inlined_call_operand.vmem [shape: f32[1,32], index: 5, kind: input, shape index: {}]   ;;  %s1458_s6 = inlined_call_operand.vmem [shape: bf16[32,128], index: 6, kind: input, shape index: {}]   ;;  %s1459_s7 = inlined_call_operand.vmem [shape: f32[1,128], index: 7, kind: input, shape index: {}]   ;;  %s1460_s8 = inlined_call_operand.hbm [shape: bf16[64,128], index: 8, kind: output, shape index: {}]  }
   0x1   :  { %s13_s29 = sshll.u32 %s1452_s0, 4  ;;  %s14_s29 = int_to_ptr.vmem [resolvable:$true] %s13_s29 }
   0x2   :  { %s1094_s30 = scalar_lea.vmem %s14_s29, 16  ;;  %p1099_p1 = scmp.lt.s32.totalorder %s14_s29, %s14_s29 }
   0x3   :  { %p1095_p0 = scmp.ne.s32.totalorder %s14_s29, %s1094_s30  ;;  %p1100_p2 = scmp.lt.s32.totalorder %s1094_s30, %s1094_s30 }
   0x5   :  { %p1101_p3 = por %p1100_p2, %p1099_p1 }
   0x7   :  { %p1102_p4 = pnand %p1101_p3, %p1095_p0 }
   0x9   :  { %1105 = shalt.err (!%p1102_p4)  }
   0xa   :  { %s1204_s9 = smov [#allocation3]  }
   0xb   :  { %16 = dma.vmem_to_smem %s14_s29, 16, %s1204_s9, [#allocation2] }
   0xc   :  { %1178 = dma.done.wait [#allocation2], 16 }
   0xd   :  { %1179 = vsyncadd [#allocation2], 4294967280 }
   0xe   :  { %18 = sfence }
   0xf   :  { %19 = vsyncpa [#allocation5], 0 }
  0x10   :  { %20 = vsyncpa [#allocation6], 0 }
  0x11   :  { %22 = vsyncpa [#allocation6 + $0x1], 0  ;;  %s1263_s10 = smov 0   ;;  %s1265_s11 = smov 0  }
  0x12   :  { %s1267_s0 = smov 0   ;;  %s1269_s12 = smov 0  }
  0x13 LB: > { %s1284_s13 = sadd.s32 4294967295, %s1202_s12   ;;  %s880_s14 = sadd.s32 4294967294, %s1202_s12   ;;  %s1202_s12 = sphi %s1269_s12, %s1476_s12   ;;  %s1198_s0 = sphi %s1267_s0, %s1475_s0   ;;  %s1194_s11 = sphi %s1265_s11, %s1474_s11   ;;  %s1190_s10 = sphi %s1263_s10, %s1473_s10  }
  0x14   : > { %s1288_s15 = sadd.s32 1, %s1202_s12   ;;  %s192_s16 = sadd.s32 1, %s1198_s0 }
  0x15   : > { %s189_s17 = ssub.s32 %s1202_s12, %s1288_s15  ;;  %p202_p5 = scmp.ne.s32.totalorder %s1198_s0, %s1194_s11 }
  0x16   : > { %p190_p6 = scmp.eq.s32.totalorder %s189_s17, 0  ;;  %p203_p7 = scmp.eq.s32.totalorder %s1284_s13, 1 }
  0x17   : > { %p208_p8 = scmp.ne.s32.totalorder %s1194_s11, %s1190_s10  ;;  %p209_p9 = scmp.eq.s32.totalorder %s880_s14, 1 }
  0x18   : > { %s1299_s18 = scalar_select %p190_p6, %s1198_s0, %s192_s16  }
  0x19   : > { %p1301_p10 = por %p203_p7, %p202_p5  ;;  %p1305_p11 = por %p209_p9, %p208_p8 }
  0x1a   : > { %p881_p12 = scmp.ge.s32.totalorder %s1202_s12, 1  ;;  %p216_p13 = scmp.lt.s32.totalorder %s1202_s12, 3 }
  0x1b   : > { %s1464_s19 = scalar_select %p1301_p10, 1, 0 }
  0x1c   : > { %s1465_s20 = scalar_select %p1305_p11, 1, 0 }
  0x1d   : > { %p1461_p0 = scmp.eq.s32.totalorder %s1284_s13, 0  ;;  %p1312_p1 = pnand %p881_p12, %p216_p13 }
  0x1e   : > { %s1205_s22 = smov [#allocation4]   ;;  %s1106_s27 = scalar_lea.hbm %s1455_s3, 256 }
  0x1f   : > { %s1466_s21 = scalar_select %p1312_p1, 1, 0 }
  0x20   : > { %s228_s23 = sshll.u32 %s1205_s22, 4  ;;  %p1006_p2 = pneg %p1312_p1  ;;  %s229_s23 = int_to_ptr.vmem [resolvable:$true] %s228_s23 }
  0x21   : > { %p1107_p4 = scmp.ne.s32.totalorder %s1455_s3, %s1106_s27  ;;  %p1113_p8 = scmp.lt.u32.totalorder %s1106_s27, %s1455_s3 }
  0x22   : > { %p1320_p3 = pnand %p1461_p0, %p1006_p2 }
  0x24   : > { %p1108_p5 = pneg %p1320_p3 }
  0x26   : > { %p1109_p6 = pnand %p1108_p5, %p1107_p4 }
  0x28   : > { %p1110_p7 = pneg %p1109_p6 }
  0x2a   : > { %p1115_p9 = pnand %p1113_p8, %p1110_p7 }
  0x2c   : > { %1118 = shalt.err (!%p1115_p9)
}
  0x2d   : > { %s1119_s14 = scalar_lea.vmem %s229_s23, 256  ;;  %p1127_p0 = scmp.lt.s32.totalorder %s229_s23, %s229_s23 }
  0x2e   : > { %p1120_p12 = scmp.ne.s32.totalorder %s229_s23, %s1119_s14  ;;  %p1128_p11 = scmp.lt.s32.totalorder %s1119_s14, %s1119_s14 }
  0x30   : > { %p1122_p13 = pnand %p1120_p12, %p1108_p5  ;;  %p1129_p10 = por %p1128_p11, %p1127_p0 }
  0x32   : > { %p1123_p2 = pneg %p1122_p13 }
  0x34   : > { %p1130_p1 = pnand %p1129_p10, %p1123_p2 }
  0x36   : > { %1133 = shalt.err (!%p1130_p1)
}
  0x37   : > { %s1206_s16 = smov 64   ;;  %s1207_s17 = smov 4  }
  0x38   : > { %1009 = dma.hbm_to_vmem [thread:$0]  (!%p1320_p3), %s1455_s3, 256, %s229_s23, [#allocation5], %s1206_s16, %s1206_s16, %s1207_s17  }
  0x39   : > { %p1468_p4 = scmp.ne.s32.totalorder %s1466_s21, 0 }
  0x3a   : > { %p1469_p6 = scmp.eq.s32.totalorder (!%p1468_p4), %s1284_s13, 0 }
  0x3b   : > { %272 = sbr.rel (%p1468_p4) target bundleno = 1523 (0x5f3), region = 48 }
  0x42   : > { %1181 = dma.done.wait (%p1469_p6), [#allocation5], 256   ;;  %p1470_p5 = pmov %p1469_p6 }
  0x43   : > { %p309_p10 = scmp.lt.s32.totalorder %s1284_s13, 1  ;;  %v1208_v0 = vmov 0.0   ;;  %vm1209_vm0 = vmmov 0   ;;  %v1059_v1 = vld [vmem:[#allocation4] sm:$0xff]   ;;  %v1060_v2 = vld [vmem:[#allocation4 + $0x8] sm:$0xff]   ;;  %vm348_vm1 = vcmask 261120   ;;  %v394_v12 = vlaneseq }
  0x44   : > { %1183 = vsyncadd (%p1470_p5), [#allocation5], 4294967040  ;;  %959 = vmatprep.subr.bf16.mxu0 %v1208_v0  ;;  %963 = vmatprep.mubr.msk.bf16.mxu0 %vm1209_vm0, %v1208_v0  ;;  %s396_s14 = sld [smem:[#allocation3 + %s1284_s13]]  ;;  %v1210_v15 = vmov -1e+10   ;;  %vm468_vm3 = vcmask 130048  }
  0x45   : > { %s310_s24 = scalar_select %p309_p10, %s1284_s13, 1  ;;  %960 = vmatpush3.bf16.msra.mxu0 %v1059_v1  ;;  %v395_v13 = vand.u32 127, %v394_v12  ;;  %v1064_v49 = vld [vmem:[%s1456_s4] sm:$0xff]   ;;  %v1065_v50 = vld [vmem:[%s1456_s4 + $0x8] sm:$0xff]   ;;  %v1066_v1 = vld [vmem:[%s1456_s4 + $0x10] sm:$0xff]   ;;  %vm622_vm4 = vcmask 523264  }
  0x46   : > { %961 = vmatprep.subr.bf16.mxu0 %v1208_v0  ;;  %s306_s17 = sand.u32 1, %s1194_s11   ;;  %s928_s27 = sshll.u32 %s1284_s13, 8 }
  0x47   : > { %s922_s26 = sshll.u32 %s310_s24, 3  ;;  %s923_s28 = sshll.u32 %s310_s24, 4 }
  0x48   : > { %s313_s21 = scalar_lea.vmem %s1453_s1, %s922_s26  ;;  %s318_s9 = scalar_lea.vmem %s1454_s2, %s923_s28 }
  0x49   : > { %v1061_v3 = vld [vmem:[%s313_s21] sm:$0xff]   ;;  %962 = vmatpush3.bf16.msra.mxu0 %v1060_v2  ;;  %v1063_v11 = vld [vmem:[%s318_s9 + $0x8] sm:$0xff]   ;;  %s1211_s24 = smov 32   ;;  %v1067_v2 = vld [vmem:[%s1456_s4 + $0x18] sm:$0xff]   ;;  %s886_s22 = sshll.u32 %s306_s17, 4 }
  0x4a   : > { %973 = vmatprep.subr.bf16.mxu0 %v1061_v3  ;;  %v1355_v4 = vld [vmem:[%s318_s9] sm:$0xff]   ;;  %v397_v14 = vstv %s396_s14  ;;  %s308_s26 = scalar_lea.vmem [#allocation7], %s886_s22  ;;  %s1409_s29 = scalar_lea.hbm %s1460_s8, %s928_s27 }
  0x4b   : > { %969 = vmatprep.mubr.msk.bf16.mxu1 %vm348_vm1, %v1355_v4  ;;  %vm398_vm2 = vcmp.lt.s32.totalorder %v395_v13, %v397_v14  ;;  %v1068_v13 = vld [vmem:[%s1458_s6] sm:$0xff]   ;;  %v1069_v14 = vld [vmem:[%s1458_s6 + $0x8] sm:$0xff]   ;;  %s794_s23 = sshll.u32 %s308_s26, 4  ;;  %s1411_s13 = scalar_lea.sflag [#allocation6], %s306_s17  ;;  %s1404_s23 = int_to_ptr.vmem [resolvable:$true] %s794_s23 }
  0x4c   : > { %964 = vmatmul.mubr.msk.bf16.vlgmr.msra.gmra.mrb[0].mxu0 %vm348_vm1, %v1061_v3  ;;  %v399_v16 = vsel %vm398_vm2, 0.0, %v1210_v15  ;;  %v901_v15 = vld [vmem:[%s1457_s5] ss:$0 sm:$0xff]  ;;  %s1134_s30 = scalar_lea.vmem %s1404_s23, 256  ;;  %p1471_p0 = scmp.ne.s32.totalorder %s1464_s19, 0 }
  0x4d   : > { %974 = vmatpush3.bf16.msra.mxu0 %v1061_v3  ;;  %p1135_p11 = scmp.ne.s32.totalorder %s1404_s23, %s1134_s30  ;;  %s1212_s9 = smov [#allocation7]  }
  0x4e   : > { %991 = vmatprep.subr.bf16.mxu0 %v1068_v13  ;;  %s1138_s14 = sshll.u32 %s1212_s9, 4  ;;  %s1139_s14 = int_to_ptr.vmem [resolvable:$false] %s1138_s14 }
  0x4f   : > { %p1136_p1 = pnand %p1135_p11, %p1471_p0  ;;  %s1140_s16 = scalar_lea.vmem %s1139_s14, 512 }
  0x50   : > { %p1141_p7 = scmp.lt.s32.totalorder %s1404_s23, %s1139_s14  ;;  %p1142_p8 = scmp.lt.s32.totalorder %s1140_s16, %s1134_s30 }
  0x51   : > { %p1137_p3 = pneg %p1136_p1 }
  0x52   : > { %p1143_p9 = por %p1142_p8, %p1141_p7 }
  0x54   : > { %p1144_p12 = pnand %p1143_p9, %p1137_p3 }
 0x11f   : > { %v386_v5 = vpop.f32.mrb[0].mxu0 }
 0x120   : > { %v965_v6 = vpop.f32.mrb[1].mxu0 }
 0x121   : > { %v389_v7 = vpop.f32.mrb[2].mxu0 }
 0x122   : > { %v393_v8 = vpack.c.bf16 %v389_v7, %v386_v5  ;;  %v966_v9 = vpop.f32.mrb[3].mxu0 }
 0x124   : > { %999 = vmatprep.subr.msk.bf16.mxu1 %vm348_vm1, %v393_v8  ;;  %v417_v10 = vsel %vm348_vm1, %v393_v8, 0 }
 0x125   : > { %968 = vmatpush3.bf16.xpose.msra.mxu1 %v417_v10 }
 0x126   : > { %979 = vmatprep.subr.bf16.mxu1 %v1064_v49 }
 0x12c   : > { %970 = vmatmul.mubr.msk.bf16.vlgmr.msra.gmra.mrb[0].mxu1 %vm348_vm1, %v1063_v11 }
 0x12d   : > { %980 = vmatpush3.bf16.msra.mxu1 %v1064_v49 }
 0x12e   : > { %981 = vmatprep.subr.bf16.mxu1 %v1065_v50 }
 0x131   : > { %982 = vmatpush3.bf16.msra.mxu1 %v1065_v50 }
 0x132   : > { %983 = vmatprep.subr.bf16.mxu1 %v1066_v1 }
 0x135   : > { %984 = vmatpush3.bf16.msra.mxu1 %v1066_v1 }
 0x136   : > { %985 = vmatprep.subr.bf16.mxu1 %v1067_v2 }
 0x139   : > { %986 = vmatpush3.bf16.msra.mxu1 %v1067_v2 }
 0x1ff   : > { %v971_v17 = vpop.f32.mrb[0].mxu1 }
 0x200   : > { %v462_v18 = vadd.f32 %v971_v17, %v399_v16  ;;  %v453_v19 = vpop.f32.mrb[1].mxu1 }
 0x201   : > { %v454_v20 = vadd.f32 %v453_v19, %v399_v16  ;;  %v972_v21 = vpop.f32.mrb[2].mxu1 }
 0x202   : > { %v465_v22 = vadd.f32 %v972_v21, %v399_v16  ;;  %v456_v23 = vpop.f32.mrb[3].mxu1  ;;  %v475_v24 = vsel %vm468_vm3, %v462_v18, -inf }
 0x203   : > { %v457_v25 = vadd.f32 %v456_v23, %v399_v16  ;;  %476 = vmax.xlane.f32.xlu1 %v475_v24  ;;  %v469_v26 = vsel %vm468_vm3, %v454_v20, -inf }
 0x204   : > { %470 = vmax.xlane.f32.xlu0 %v469_v26  ;;  %v478_v27 = vsel %vm468_vm3, %v465_v22, -inf }
 0x205   : > { %v472_v28 = vsel %vm468_vm3, %v457_v25, -inf }
 0x207   : > { %479 = vmax.xlane.f32.xlu1 %v478_v27 }
 0x208   : > { %473 = vmax.xlane.f32.xlu0 %v472_v28 }
 0x290   : > { %v477_v29 = vpop.xlane.xlu1 %476 }
 0x291   : > { %v483_v30 = vsub.f32 %v462_v18, %v477_v29  ;;  %v471_v31 = vpop.xlane.xlu0 %470 }
 0x292   : > { %v481_v32 = vsub.f32 %v454_v20, %v471_v31  ;;  %v908_v31 = vld [vmem:[%s1459_s7] ss:$0 sm:$0xff] }
 0x293   : > { %v489_v33 = vmul.f32 1.442695, %v483_v30 }
 0x294   : > { %v485_v34 = vmul.f32 1.442695, %v481_v32  ;;  %v480_v35 = vpop.xlane.xlu1 %479 }
 0x295   : > { %v484_v36 = vsub.f32 %v465_v22, %v480_v35  ;;  %v474_v37 = vpop.xlane.xlu0 %473 }
 0x296   : > { %1070 = vpow2.f32 %v485_v34  ;;  %v482_v38 = vsub.f32 %v457_v25, %v474_v37 }
 0x297   : > { %1072 = vpow2.f32 %v489_v33  ;;  %v491_v39 = vmul.f32 1.442695, %v484_v36 }
 0x298   : > { %v487_v40 = vmul.f32 1.442695, %v482_v38 }
 0x29a   : > { %1074 = vpow2.f32 %v487_v40 }
 0x29b   : > { %1076 = vpow2.f32 %v491_v39 }
 0x2a0   : > { %v1071_v41 = vpop.eup %1070 }
 0x2a1   : > { %v493_v42 = vsel %vm468_vm3, %v1071_v41, 0.0  ;;  %v1073_v43 = vpop.eup %1072 }
 0x2a2   : > { %494 = vadd.xlane.f32.xlu0 %v493_v42  ;;  %v499_v45 = vsel %vm468_vm3, %v1073_v43, 0.0 }
 0x2a4   : > { %v1075_v44 = vpop.eup %1074 }
 0x2a5   : > { %v496_v46 = vsel %vm468_vm3, %v1075_v44, 0.0  ;;  %v1077_v47 = vpop.eup %1076 }
 0x2a6   : > { %500 = vadd.xlane.f32.xlu0 %v499_v45  ;;  %497 = vadd.xlane.f32.xlu1 %v496_v46  ;;  %v502_v48 = vsel %vm468_vm3, %v1077_v47, 0.0 }
 0x2aa   : > { %503 = vadd.xlane.f32.xlu1 %v502_v48 }
 0x2bb   : > { %575 = vrot.lane.b32.xlu1 %v1063_v11, %s1211_s24 }
 0x2bc   : > { %573 = vrot.lane.b32.xlu0 %v1355_v4, %s1211_s24 }
 0x32f   : > { %v495_v51 = vpop.xlane.xlu0 %494 }
 0x330   : > { %1078 = vrcp.f32 %v495_v51 }
 0x333   : > { %v498_v52 = vpop.xlane.xlu1 %497  ;;  %v501_v53 = vpop.xlane.xlu0 %500 }
 0x334   : > { %1080 = vrcp.f32 %v498_v52 }
 0x335   : > { %1082 = vrcp.f32 %v501_v53 }
 0x337   : > { %v504_v54 = vpop.xlane.xlu1 %503  ;;  %v574_v8 = vpop.permute.xlu0 %573 }
 0x338   : > { %1084 = vrcp.f32 %v504_v54 }
 0x33a   : > { %v1079_v55 = vpop.eup %1078 }
 0x33b   : > { %v509_v57 = vmul.f32 %v1079_v55, %v1071_v41  ;;  %v576_v10 = vpop.permute.xlu1 %575 }
 0x33e   : > { %v1081_v56 = vpop.eup %1080 }
 0x33f   : > { %v510_v58 = vmul.f32 %v1081_v56, %v1075_v44  ;;  %v1083_v59 = vpop.eup %1082 }
 0x340   : > { %v511_v62 = vmul.f32 %v1083_v59, %v1073_v43 }
 0x341   : > { %v513_v60 = vpack.c.bf16 %v510_v58, %v509_v57 }
 0x342   : > { %v1085_v61 = vpop.eup %1084 }
 0x343   : > { %v512_v63 = vmul.f32 %v1085_v61, %v1077_v47  ;;  %975 = vmatprep.mubr.msk.bf16.mxu0 %vm468_vm3, %v513_v60 }
 0x345   : > { %v514_v0 = vpack.c.bf16 %v512_v63, %v511_v62 }
 0x347   : > { %976 = vmatmul.mubr.msk.bf16.vlgmr.msra.gmra.mrb[4].mxu0 %vm468_vm3, %v514_v0 }
 0x348   : > { %992 = vmatpush3.bf16.msra.mxu0 %v1068_v13 }
 0x349   : > { %993 = vmatprep.subr.bf16.mxu0 %v1069_v14 }
 0x34c   : > { %994 = vmatpush3.bf16.msra.mxu0 %v1069_v14 }
 0x41a   : > { %v977_v3 = vpop.f32.mrb[4].mxu0 }
 0x41b   : > { %v556_v4 = vpop.f32.mrb[5].mxu0 }
 0x41c   : > { %v978_v5 = vpop.f32.mrb[6].mxu0 }
 0x41d   : > { %v572_v6 = vpack.c.bf16 %v978_v5, %v977_v3  ;;  %v559_v7 = vpop.f32.mrb[7].mxu0 }
 0x41e   : > { %v571_v9 = vpack.c.bf16 %v559_v7, %v556_v4 }
 0x41f   : > { %v582_v12 = vsel %vm348_vm1, %v572_v6, %v576_v10 }
 0x420   : > { %v579_v11 = vsel %vm348_vm1, %v571_v9, %v574_v8 }
 0x421   : > { %987 = vmatprep.mubr.msk.bf16.mxu1 %vm622_vm4, %v579_v11 }
 0x422   : > { %988 = vmatmul.mubr.msk.bf16.vlgmr.msra.gmra.mrb[4].mxu1 %vm622_vm4, %v582_v12 }
 0x4f5   : > { %v989_v16 = vpop.f32.mrb[4].mxu1 }
 0x4f6   : > { %v670_v17 = vadd.f32 %v989_v16, %v901_v15  ;;  %v661_v18 = vpop.f32.mrb[5].mxu1 }
 0x4f7   : > { %v662_v19 = vadd.f32 %v901_v15, %v661_v18  ;;  %v990_v20 = vpop.f32.mrb[6].mxu1 }
 0x4f8   : > { %1086 = vtanh.f32 %v670_v17  ;;  %v673_v21 = vadd.f32 %v990_v20, %v901_v15  ;;  %v664_v22 = vpop.f32.mrb[7].mxu1 }
 0x4f9   : > { %1088 = vtanh.f32 %v662_v19  ;;  %v665_v23 = vadd.f32 %v901_v15, %v664_v22 }
 0x4fa   : > { %1090 = vtanh.f32 %v673_v21 }
 0x4fb   : > { %1092 = vtanh.f32 %v665_v23 }
 0x502   : > { %v1087_v24 = vpop.eup %1086 }
 0x503   : > { %v1089_v25 = vpop.eup %1088 }
 0x504   : > { %v1091_v26 = vpop.eup %1090 }
 0x505   : > { %v1093_v27 = vpop.eup %1092  ;;  %v681_v28 = vpack.c.bf16 %v1091_v26, %v1087_v24 }
 0x506   : > { %v680_v29 = vpack.c.bf16 %v1093_v27, %v1089_v25 }
 0x508   : > { %995 = vmatprep.mubr.msk.bf16.mxu0 %vm348_vm1, %v680_v29 }
 0x509   : > { %996 = vmatmul.mubr.msk.bf16.vlgmr.msra.gmra.mrb[8].mxu0 %vm348_vm1, %v681_v28 }
 0x5dc   : > { %v997_v30 = vpop.f32.mrb[8].mxu0 }
 0x5dd   : > { %v745_v32 = vpop.f32.mrb[9].mxu0  ;;  %v754_v34 = vadd.f32 %v997_v30, %v908_v31 }
 0x5de   : > { %v998_v33 = vpop.f32.mrb[10].mxu0  ;;  %v746_v37 = vadd.f32 %v908_v31, %v745_v32 }
 0x5df   : > { %v757_v35 = vadd.f32 %v998_v33, %v908_v31  ;;  %v748_v36 = vpop.f32.mrb[11].mxu0 }
 0x5e0   : > { %v749_v38 = vadd.f32 %v908_v31, %v748_v36 }
 0x5e1   : > { %v937_v39 = vpack.c.bf16 %v757_v35, %v754_v34 }
 0x5e2   : > { %v932_v40 = vpack.c.bf16 %v749_v38, %v746_v37 }
 0x5e3   : > { %939 = vst [vmem:[%s308_s26 + $0x8] sm:$0xff] %v937_v39  }
 0x5e4   : > { %933 = vst [vmem:[%s308_s26] sm:$0xff] %v932_v40  }
 0x5e5   : > { %1147 = shalt.err (!%p1144_p12)
}
 0x5e6   : > { %s1148_s17 = scalar_lea.hbm %s1409_s29, 256  ;;  %s1152_s24 = scalar_lea.hbm %s1460_s8, 512 }
 0x5e7   : > { %p1149_p13 = scmp.ne.s32.totalorder %s1409_s29, %s1148_s17  ;;  %p1153_p6 = scmp.lt.u32.totalorder %s1409_s29, %s1460_s8 }
 0x5e8   : > { %p1154_p5 = scmp.lt.u32.totalorder %s1152_s24, %s1148_s17  ;;  %p1156_p11 = scmp.lt.u32.totalorder %s1148_s17, %s1409_s29 }
 0x5e9   : > { %p1150_p2 = pnand %p1149_p13, %p1471_p0 }
 0x5ea   : > { %p1155_p10 = por %p1154_p5, %p1153_p6 }
 0x5eb   : > { %p1151_p4 = pneg %p1150_p2 }
 0x5ec   : > { %p1157_p1 = por %p1156_p11, %p1155_p10 }
 0x5ee   : > { %p1158_p3 = pnand %p1157_p1, %p1151_p4 }
 0x5f0   : > { %1161 = shalt.err (!%p1158_p3)
}
 0x5f1   : > { %s1213_s21 = smov 64   ;;  %s1214_s28 = smov 4  }
 0x5f2   : > { %1004 = dma.vmem_to_hbm [thread:$0]  (%p1471_p0), %s1404_s23, 256, %s1409_s29, %s1411_s13, %s1213_s21, %s1213_s21, %s1214_s28  }
 0x5f3 PF: > { %p1016_p7 = scmp.ge.s32.totalorder %s1202_s12, 2  ;;  %s809_s30 = sand.u32 1, %s1190_s10  }
 0x5f4   : > { %p1472_p8 = scmp.ne.s32.totalorder %s1465_s20, 0  ;;  %s810_s9 = scalar_lea.sflag [#allocation6], %s809_s30 }
 0x5f6   : > { %p1011_p9 = pnand %p1016_p7, %p1472_p8 }
 0x5f8   : > { %1185 = dma.done.wait (!%p1011_p9), %s810_s9, 256  }
 0x5f9   : > { %1187 = vsyncadd (!%p1011_p9), %s810_s9, 4294967040  ;;  %p25_p12 = scmp.ge.s32.totalorder %s1288_s15, 4   ;;  %s1473_s10 = smov %s1194_s11 }
 0x5fa   : > { %s1474_s11 = smov %s1198_s0  ;;  %s1475_s0 = smov %s1299_s18 }
 0x5fb   : > { %s1476_s12 = smov %s1288_s15  ;;  %27 = sbr.rel (!%p25_p12) target bundleno = 19 (0x13), region = 91 }
 0x602   :  { %815 = vsyncpa [#allocation5], 1 }
 0x603   :  { %817 = vsyncpa [#allocation5 + $0x1], 1 }
 0x604   :  { %818 = vsyncpa [#allocation6], 1 }
 0x605   :  { %820 = vsyncpa [#allocation6 + $0x1], 1 }

</bundles_post_ra>
